<compile_context>
chip_gen: v7x
topology: tpu7x:2x2x1
jax: 0.10.0
libtpu: 0.0.40
codegen_flags: <defaults>
</compile_context>

<pallas_src>
import functools

import jax
import jax.numpy as jnp
from jax.experimental import pallas as pl
from jax.experimental.pallas import tpu as pltpu


def _round_up(x, m):
    return ((x + m - 1) // m) * m


def theta_net_kernel(x_ref, w23_ref, smalls_ref, o_ref, *, hidden, chunk_n):
    # Small parameters, loaded once per grid step.  All slices are sublane
    # slices at multiples of 8 -> tile-aligned, no lane shuffles.
    w2 = w23_ref[0:hidden, :]                             # (H, H)
    w3 = w23_ref[hidden:hidden + 1, :]                    # (1, H)
    w1c = smalls_ref[0:hidden, :]                         # (H, 1)
    b1c = smalls_ref[hidden:2 * hidden, :]                # (H, 1)
    b2c = smalls_ref[2 * hidden:3 * hidden, :]            # (H, 1)
    b3c = smalls_ref[3 * hidden:3 * hidden + 1, :]        # (1, 1)

    n_chunks = x_ref.shape[1] // chunk_n                  # static

    def body(c, carry):
        off = pl.multiple_of(c * chunk_n, chunk_n)
        x = x_ref[:, pl.ds(off, chunk_n)]                 # (1, C) lane-dense
        # Layer 1: K=1 outer product -> VPU broadcast mul+add, tanh on EUP.
        h1 = jnp.tanh(w1c * x + b1c)                      # (H, C)
        # Layer 2: (H,H)@(H,C) on the MXU, f32 accumulate, tanh on EUP.
        h2 = jnp.tanh(
            jnp.dot(w2, h1, preferred_element_type=jnp.float32) + b2c
        )                                                 # (H, C)
        # Layer 3: (1,H)@(H,C) -> lane-dense (1,C), unmasked store.
        o_ref[:, pl.ds(off, chunk_n)] = (
            jnp.dot(w3, h2, preferred_element_type=jnp.float32) + b3c
        )
        return carry

    jax.lax.fori_loop(0, n_chunks, body, 0, unroll=True)


def theta_net_forward(psi, params, *, chunk_n=512, max_tile=4096):
    """psi: (N, 1) float32.  Returns (N, 1) float32 (same as ThetaNet.forward)."""
    w1, b1, w2, b2, w3, b3 = params
    N, in_dim = psi.shape
    hidden = w1.shape[0]
    out_dim = w3.shape[0]
    assert in_dim == w1.shape[1] == 1
    assert out_dim == 1
    assert hidden % 8 == 0          # sublane-aligned in-kernel slicing

    f32 = jnp.float32

    # --- pack the 7 parameters into 2 small operands -----------------------
    # w23: rows [0, H) = W2, row H = w3 row; padded to a multiple of 8 rows.
    rows23 = _round_up(hidden + 1, 8)
    w23 = jnp.zeros((rows23, hidden), f32)
    w23 = w23.at[0:hidden, :].set(w2.astype(f32))
    w23 = w23.at[hidden, :].set(w3[0].astype(f32))

    # smalls: single column holding [w1 ; b1 ; b2 ; b3] stacked along sublanes.
    srows = _round_up(3 * hidden + 1, 8)
    smalls = jnp.zeros((srows, 1), f32)
    smalls = smalls.at[0:hidden, 0].set(w1[:, 0].astype(f32))
    smalls = smalls.at[hidden:2 * hidden, 0].set(b1.astype(f32))
    smalls = smalls.at[2 * hidden:3 * hidden, 0].set(b2.astype(f32))
    smalls = smalls.at[3 * hidden, 0].set(b3[0].astype(f32))

    # Transposed, lane-dense layout: batch -> lanes.  No wrapper-side padding:
    # Pallas clamp-reads / masked-writes the ragged last block.
    x_t = psi.reshape(1, N).astype(f32)                   # (1, N)

    # --- tile selection -----------------------------------------------------
    if N <= max_tile:
        tile_n = _round_up(N, chunk_n)                    # single grid step
    else:
        n_steps = pl.cdiv(N, max_tile)
        n_steps += n_steps % 2                            # even count for v7x's 2 TCs
        tile_n = _round_up(pl.cdiv(N, n_steps), chunk_n)
    grid = (pl.cdiv(N, tile_n),)

    kernel = functools.partial(theta_net_kernel, hidden=hidden, chunk_n=chunk_n)

    out_t = pl.pallas_call(
        kernel,
        out_shape=jax.ShapeDtypeStruct((out_dim, N), f32),
        grid_spec=pltpu.PrefetchScalarGridSpec(
            num_scalar_prefetch=0,
            grid=grid,
            in_specs=[
                pl.BlockSpec((1, tile_n), lambda i: (0, i)),        # psi lane tile
                pl.BlockSpec((rows23, hidden), lambda i: (0, 0)),   # [W2 ; w3]
                pl.BlockSpec((srows, 1), lambda i: (0, 0)),         # [w1; b1; b2; b3]
            ],
            out_specs=pl.BlockSpec((out_dim, tile_n), lambda i: (0, i)),
        ),
        compiler_params=pltpu.CompilerParams(
            dimension_semantics=("parallel",),                      # v7x: 2 TCs
        ),
        cost_estimate=pl.CostEstimate(
            flops=(2 * hidden * hidden + 4 * hidden) * N,           # ~2176*N
            transcendentals=2 * hidden * N,                         # 64 tanh / element
            bytes_accessed=8 * N,                                   # 4 B in + 4 B out
        ),
    )(x_t, w23, smalls)

    return out_t.reshape(N, out_dim)


def init_params(key, input_dim=1, hidden_dim=32, output_dim=1):
    """PyTorch nn.Linear-style init: W (out,in), b (out,), U(-1/sqrt(fan_in), ...)."""
    ks = jax.random.split(key, 6)

    def linear(kw, kb, fan_in, fan_out):
        bound = 1.0 / jnp.sqrt(fan_in)
        w = jax.random.uniform(kw, (fan_out, fan_in), jnp.float32, -bound, bound)
        b = jax.random.uniform(kb, (fan_out,), jnp.float32, -bound, bound)
        return w, b

    w1, b1 = linear(ks[0], ks[1], input_dim, hidden_dim)
    w2, b2 = linear(ks[2], ks[3], hidden_dim, hidden_dim)
    w3, b3 = linear(ks[4], ks[5], hidden_dim, output_dim)
    return (w1, b1, w2, b2, w3, b3)


def theta_net_ref(psi, params):
    """Pure-JAX reference (PyTorch semantics: y = x @ W.T + b)."""
    w1, b1, w2, b2, w3, b3 = params
    hp = jax.lax.Precision.HIGHEST
    h1 = jnp.tanh(jnp.dot(psi, w1.T, precision=hp) + b1)
    h2 = jnp.tanh(jnp.dot(h1, w2.T, precision=hp) + b2)
    return jnp.dot(h2, w3.T, precision=hp) + b3


if __name__ == "__main__":
    key = jax.random.PRNGKey(0)
    k_param, k_x = jax.random.split(key)

    # N not a tile multiple: exercises the ragged last block (no wrapper pad).
    N, input_dim, hidden_dim, output_dim = 1000, 1, 32, 1
    params = init_params(k_param, input_dim, hidden_dim, output_dim)
    psi = jax.random.normal(k_x, (N, input_dim), jnp.float32)   # (N, 1)

    fwd = jax.jit(theta_net_forward)
    out = jax.block_until_ready(fwd(psi, params))               # grid=(1,), 2 chunks

    ref = theta_net_ref(psi, params)
    assert out.shape == (N, output_dim)
    assert jnp.allclose(out, ref, atol=1e-5, rtol=1e-5), "mismatch vs reference"

    print("KERNEL_OK")
</pallas_src>

<mosaic_0001>
module attributes {stable_mosaic.version = 11 : i64} {
  func.func @theta_net_kernel(%arg0: i32, %arg1: memref<1x1024xf32, #tpu.memory_space<vmem>>, %arg2: memref<40x32xf32, #tpu.memory_space<vmem>>, %arg3: memref<104x1xf32, #tpu.memory_space<vmem>>, %arg4: memref<1x1024xf32, #tpu.memory_space<vmem>>) attributes {dimension_semantics = [#tpu.dimension_semantics<parallel>], iteration_bounds = array<i64: 1>, scalar_prefetch = 0 : i64, scratch_operands = 0 : i64, tpu.core_type = #tpu.core_type<tc>, window_params = [{transform_indices = @transform_0, window_bounds = array<i64: 1, 1024>}, {pipeline_mode = #tpu.pipeline_mode<synchronous>, transform_indices = @transform_1, window_bounds = array<i64: 40, 32>}, {pipeline_mode = #tpu.pipeline_mode<synchronous>, transform_indices = @transform_2, window_bounds = array<i64: 104, 1>}, {transform_indices = @transform_3, window_bounds = array<i64: 1, 1024>}]} {
    %c0 = arith.constant 0 : index
    %c0_0 = arith.constant 0 : index
    %0 = vector.load %arg2[%c0, %c0_0] : memref<40x32xf32, #tpu.memory_space<vmem>>, vector<32x32xf32>
    %c32 = arith.constant 32 : index
    %c0_1 = arith.constant 0 : index
    %1 = vector.load %arg2[%c32, %c0_1] : memref<40x32xf32, #tpu.memory_space<vmem>>, vector<1x32xf32>
    %c0_2 = arith.constant 0 : index
    %c0_3 = arith.constant 0 : index
    %2 = vector.load %arg3[%c0_2, %c0_3] : memref<104x1xf32, #tpu.memory_space<vmem>>, vector<32x1xf32>
    %c32_4 = arith.constant 32 : index
    %c0_5 = arith.constant 0 : index
    %3 = vector.load %arg3[%c32_4, %c0_5] : memref<104x1xf32, #tpu.memory_space<vmem>>, vector<32x1xf32>
    %c64 = arith.constant 64 : index
    %c0_6 = arith.constant 0 : index
    %4 = vector.load %arg3[%c64, %c0_6] : memref<104x1xf32, #tpu.memory_space<vmem>>, vector<32x1xf32>
    %c96 = arith.constant 96 : index
    %c0_7 = arith.constant 0 : index
    %5 = vector.load %arg3[%c96, %c0_7] : memref<104x1xf32, #tpu.memory_space<vmem>>, vector<1x1xf32>
    %c0_i32 = arith.constant 0 : i32
    %c512_i32 = arith.constant 512 : i32
    %6 = arith.muli %c0_i32, %c512_i32 : i32
    %7 = tpu.assume_multiple %6, 512 : i32
    %c0_8 = arith.constant 0 : index
    %8 = arith.index_cast %7 : i32 to index
    %9 = vector.load %arg1[%c0_8, %8] : memref<1x1024xf32, #tpu.memory_space<vmem>>, vector<1x512xf32>
    %10 = vector.broadcast %2 : vector<32x1xf32> to vector<32x512xf32>
    %11 = vector.broadcast %9 : vector<1x512xf32> to vector<32x512xf32>
    %12 = arith.mulf %10, %11 : vector<32x512xf32>
    %13 = vector.broadcast %3 : vector<32x1xf32> to vector<32x512xf32>
    %14 = arith.addf %12, %13 : vector<32x512xf32>
    %15 = math.tanh %14 : vector<32x512xf32>
    %cst = arith.constant dense<0.000000e+00> : vector<32x512xf32>
    %16 = tpu.matmul %0, %15, %cst {dimension_numbers = #tpu.dot_dimension_numbers<[1], [0], [0], [1], [0, 0, 1, 1], [], []>} : vector<32x32xf32>, vector<32x512xf32>, vector<32x512xf32> -> vector<32x512xf32>
    %17 = vector.broadcast %4 : vector<32x1xf32> to vector<32x512xf32>
    %18 = arith.addf %16, %17 : vector<32x512xf32>
    %19 = math.tanh %18 : vector<32x512xf32>
    %cst_9 = arith.constant dense<0.000000e+00> : vector<1x512xf32>
    %20 = tpu.matmul %1, %19, %cst_9 {dimension_numbers = #tpu.dot_dimension_numbers<[1], [0], [0], [1], [0, 0, 1, 1], [], []>} : vector<1x32xf32>, vector<32x512xf32>, vector<1x512xf32> -> vector<1x512xf32>
    %21 = vector.broadcast %5 : vector<1x1xf32> to vector<1x512xf32>
    %22 = arith.addf %20, %21 : vector<1x512xf32>
    %c0_10 = arith.constant 0 : index
    %23 = arith.index_cast %7 : i32 to index
    %24 = vector.load %arg4[%c0_10, %23] : memref<1x1024xf32, #tpu.memory_space<vmem>>, vector<1x512xf32>
    tpu.vector_store %arg4[%c0_10, %23], %22 {strides = array<i32>} : memref<1x1024xf32, #tpu.memory_space<vmem>>, vector<1x512xf32>,
    %c1_i32 = arith.constant 1 : i32
    %c512_i32_11 = arith.constant 512 : i32
    %25 = arith.muli %c1_i32, %c512_i32_11 : i32
    %26 = tpu.assume_multiple %25, 512 : i32
    %c0_12 = arith.constant 0 : index
    %27 = arith.index_cast %26 : i32 to index
    %28 = vector.load %arg1[%c0_12, %27] : memref<1x1024xf32, #tpu.memory_space<vmem>>, vector<1x512xf32>
    %29 = vector.broadcast %2 : vector<32x1xf32> to vector<32x512xf32>
    %30 = vector.broadcast %28 : vector<1x512xf32> to vector<32x512xf32>
    %31 = arith.mulf %29, %30 : vector<32x512xf32>
    %32 = vector.broadcast %3 : vector<32x1xf32> to vector<32x512xf32>
    %33 = arith.addf %31, %32 : vector<32x512xf32>
    %34 = math.tanh %33 : vector<32x512xf32>
    %cst_13 = arith.constant dense<0.000000e+00> : vector<32x512xf32>
    %35 = tpu.matmul %0, %34, %cst_13 {dimension_numbers = #tpu.dot_dimension_numbers<[1], [0], [0], [1], [0, 0, 1, 1], [], []>} : vector<32x32xf32>, vector<32x512xf32>, vector<32x512xf32> -> vector<32x512xf32>
    %36 = vector.broadcast %4 : vector<32x1xf32> to vector<32x512xf32>
    %37 = arith.addf %35, %36 : vector<32x512xf32>
    %38 = math.tanh %37 : vector<32x512xf32>
    %cst_14 = arith.constant dense<0.000000e+00> : vector<1x512xf32>
    %39 = tpu.matmul %1, %38, %cst_14 {dimension_numbers = #tpu.dot_dimension_numbers<[1], [0], [0], [1], [0, 0, 1, 1], [], []>} : vector<1x32xf32>, vector<32x512xf32>, vector<1x512xf32> -> vector<1x512xf32>
    %40 = vector.broadcast %5 : vector<1x1xf32> to vector<1x512xf32>
    %41 = arith.addf %39, %40 : vector<1x512xf32>
    %c0_15 = arith.constant 0 : index
    %42 = arith.index_cast %26 : i32 to index
    %43 = vector.load %arg4[%c0_15, %42] : memref<1x1024xf32, #tpu.memory_space<vmem>>, vector<1x512xf32>
    tpu.vector_store %arg4[%c0_15, %42], %41 {strides = array<i32>} : memref<1x1024xf32, #tpu.memory_space<vmem>>, vector<1x512xf32>,
    %c2_i32 = arith.constant 2 : i32
    return
  }
  func.func @transform_0(%arg0: i32) -> (i32, i32) {
    %c0_i32 = arith.constant 0 : i32
    %c0_i32_0 = arith.constant 0 : i32
    return %c0_i32, %arg0 : i32, i32
  }
  func.func @transform_1(%arg0: i32) -> (i32, i32) {
    %c0_i32 = arith.constant 0 : i32
    %c0_i32_0 = arith.constant 0 : i32
    %c0_i32_1 = arith.constant 0 : i32
    return %c0_i32, %c0_i32_0 : i32, i32
  }
  func.func @transform_2(%arg0: i32) -> (i32, i32) {
    %c0_i32 = arith.constant 0 : i32
    %c0_i32_0 = arith.constant 0 : i32
    %c0_i32_1 = arith.constant 0 : i32
    return %c0_i32, %c0_i32_0 : i32, i32
  }
  func.func @transform_3(%arg0: i32) -> (i32, i32) {
    %c0_i32 = arith.constant 0 : i32
    %c0_i32_0 = arith.constant 0 : i32
    return %c0_i32, %arg0 : i32, i32
  }
}

</mosaic_0001>

<bundles_post_ra>
// kernel: theta_net_forward.1
= control target key start
LH: loop header
LB: loop body
LE: loop exit
PB: predicated region body
PF: predicated region fallthrough
CT: control target
= control target key end

     0   :  { %v1249_v2 = vmov 0   ;;  %s1586_s0 = inlined_call_operand.vmem [shape: f32[1,1000], index: 0, kind: input, shape index: {}]   ;;  %s1587_s1 = inlined_call_operand.vmem [shape: f32[40,32], index: 1, kind: input, shape index: {}]   ;;  %s1588_s2 = inlined_call_operand.vmem [shape: f32[104,1], index: 2, kind: input, shape index: {}]   ;;  %s1589_s3 = inlined_call_operand.hbm [shape: f32[1,1000], index: 3, kind: output, shape index: {}]  }
   0x1   :  { %v24_v0 = vld [vmem:[%s1588_s2 + $0x20] sm:$0xff]  ;;  %1096 = vset.pattern.permute.xlu1 %v1249_v2  ;;  %1095 = vset.pattern.permute.xlu0 %v1249_v2  ;;  %v25_v3 = vld [vmem:[%s1588_s2 + $0x28] sm:$0xff] }
   0x2   :  { %v20_v1 = vld [vmem:[%s1588_s2] sm:$0xff]  ;;  %93 = vperm.xlu1 %1096, %v24_v0   ;;  %v21_v4 = vld [vmem:[%s1588_s2 + $0x8] sm:$0xff] }
   0x3   :  { %36 = vperm.xlu0 %1095, %v20_v1  }
   0x4   :  { %8 = vsyncpa [#allocation3], 0  ;;  %v23_v5 = vld [vmem:[%s1588_s2 + $0x18] sm:$0xff]  ;;  %v22_v6 = vld [vmem:[%s1588_s2 + $0x10] sm:$0xff]  ;;  %v1250_v14 = vmov 0.0   ;;  %v55_v15 = vlaneseq  ;;  %vm163_vm0 = vcmask 261120  }
   0x5   :  { %v27_v7 = vld [vmem:[%s1588_s2 + $0x38] sm:$0xff]  ;;  %v26_v8 = vld [vmem:[%s1588_s2 + $0x30] sm:$0xff]  ;;  %v29_v9 = vld [vmem:[%s1588_s2 + $0x48] sm:$0xff]  ;;  %240 = vmatprep.mubr.f32.mxu0 %v1250_v14  ;;  %329 = vmatprep.mubr.f32.mxu1 %v1250_v14 }
   0x6   :  { %98 = vperm.xlu1 %1096, %v25_v3   ;;  %v28_v10 = vld [vmem:[%s1588_s2 + $0x40] sm:$0xff]  ;;  %v31_v11 = vld [vmem:[%s1588_s2 + $0x58] sm:$0xff]  ;;  %v30_v12 = vld [vmem:[%s1588_s2 + $0x50] sm:$0xff]  ;;  %v1315_v16 = vshrl.u32 %v55_v15, 7  ;;  %vm1541_vm1 = vcmp.lt.s32.totalorder %v55_v15, 512 }
   0x7   :  { %41 = vperm.xlu0 %1095, %v21_v4   ;;  %v32_v13 = vld [vmem:[%s1588_s2 + $0x60] sm:$0x1]  ;;  %v1016_v21 = vld [vmem:[%s1586_s0 + $0x4] sm:$0xf] }
   0x8   :  { %v57_v17 = vsub.s32 0, %v1315_v16  ;;  %v65_v18 = vsub.s32 2, %v1315_v16  ;;  %v61_v19 = vsub.s32 1, %v1315_v16  ;;  %v69_v20 = vsub.s32 3, %v1315_v16  ;;  %v33_v22 = vld [vmem:[%s1586_s0] sm:$0xf] }
   0xa   :  { %51 = vperm.xlu1 %1096, %v23_v5   ;;  %v560_v23 = vrot.slane %v1016_v21, %v57_v17  ;;  %v568_v24 = vrot.slane %v1016_v21, %v65_v18  ;;  %v62_v25 = vrot.slane %v33_v22, %v61_v19  ;;  %v70_v26 = vrot.slane %v33_v22, %v69_v20 }
   0xb   :  { %46 = vperm.xlu0 %1095, %v22_v6   ;;  %v58_v27 = vrot.slane %v33_v22, %v57_v17  ;;  %v66_v28 = vrot.slane %v33_v22, %v65_v18  ;;  %v1327_v29 = vrot.slane %v1016_v21, %v61_v19  ;;  %v1329_v30 = vrot.slane %v1016_v21, %v69_v20 }
   0xe   :  { %108 = vperm.xlu1 %1096, %v27_v7  }
   0xf   :  { %103 = vperm.xlu0 %1095, %v26_v8  }
  0x12   :  { %150 = vperm.xlu1 %1096, %v29_v9  }
  0x13   :  { %145 = vperm.xlu0 %1095, %v28_v10  }
  0x16   :  { %160 = vperm.xlu1 %1096, %v31_v11  }
  0x17   :  { %155 = vperm.xlu0 %1095, %v30_v12  }
  0x1b   :  { %372 = vperm.xlu0 %1095, %v32_v13  }
  0x81   :  { %v94_v31 = vpop.permute.xlu1 %93 }
  0x82   :  { %v37_v32 = vpop.permute.xlu0 %36 }
  0x83   :  { %v577_v33 = vmul.f32 %v560_v23, %v37_v32  ;;  %v579_v34 = vmul.f32 %v568_v24, %v37_v32  ;;  %v76_v35 = vmul.f32 %v62_v25, %v37_v32  ;;  %v78_v36 = vmul.f32 %v70_v26, %v37_v32 }
  0x84   :  { %v75_v37 = vmul.f32 %v58_v27, %v37_v32  ;;  %v77_v38 = vmul.f32 %v66_v28, %v37_v32  ;;  %v578_v39 = vmul.f32 %v1327_v29, %v37_v32  ;;  %v580_v40 = vmul.f32 %v1329_v30, %v37_v32 }
  0x85   :  { %v112_v41 = vadd.f32 %v94_v31, %v76_v35  ;;  %v114_v42 = vadd.f32 %v94_v31, %v78_v36  ;;  %v1333_v43 = vadd.f32 %v577_v33, %v94_v31  ;;  %v1335_v44 = vadd.f32 %v579_v34, %v94_v31  ;;  %v99_v45 = vpop.permute.xlu1 %98 }
  0x86   :  { %v42_v46 = vpop.permute.xlu0 %41  ;;  %v111_v47 = vadd.f32 %v94_v31, %v75_v37  ;;  %v113_v48 = vadd.f32 %v94_v31, %v77_v38  ;;  %v1337_v49 = vadd.f32 %v578_v39, %v94_v31  ;;  %v1339_v50 = vadd.f32 %v580_v40, %v94_v31 }
  0x87   :  { %v581_v51 = vmul.f32 %v560_v23, %v42_v46  ;;  %v583_v52 = vmul.f32 %v568_v24, %v42_v46  ;;  %v80_v53 = vmul.f32 %v62_v25, %v42_v46  ;;  %1097 = vtanh.f32 %v112_v41 }
  0x88   :  { %v82_v54 = vmul.f32 %v70_v26, %v42_v46  ;;  %1099 = vtanh.f32 %v114_v42  ;;  %v79_v55 = vmul.f32 %v58_v27, %v42_v46  ;;  %v81_v56 = vmul.f32 %v66_v28, %v42_v46 }
  0x89   :  { %v116_v57 = vadd.f32 %v99_v45, %v80_v53  ;;  %1101 = vtanh.f32 %v111_v47  ;;  %v582_v58 = vmul.f32 %v1327_v29, %v42_v46  ;;  %v584_v59 = vmul.f32 %v1329_v30, %v42_v46  ;;  %v52_v60 = vpop.permute.xlu1 %51 }
  0x8a   :  { %v47_v61 = vpop.permute.xlu0 %46  ;;  %v118_v62 = vadd.f32 %v99_v45, %v82_v54  ;;  %v115_v63 = vadd.f32 %v99_v45, %v79_v55  ;;  %v117_v0 = vadd.f32 %v99_v45, %v81_v56  ;;  %1103 = vtanh.f32 %v113_v48 }
  0x8b   :  { %v589_v1 = vmul.f32 %v560_v23, %v52_v60  ;;  %v591_v2 = vmul.f32 %v568_v24, %v52_v60  ;;  %v585_v3 = vmul.f32 %v560_v23, %v47_v61  ;;  %v587_v4 = vmul.f32 %v568_v24, %v47_v61 }
  0x8c   :  { %1105 = vtanh.f32 %v116_v57  ;;  %v84_v5 = vmul.f32 %v62_v25, %v47_v61  ;;  %v88_v6 = vmul.f32 %v62_v25, %v52_v60  ;;  %v86_v7 = vmul.f32 %v70_v26, %v47_v61 }
  0x8d   :  { %1107 = vtanh.f32 %v118_v62  ;;  %v90_v8 = vmul.f32 %v70_v26, %v52_v60  ;;  %v83_v9 = vmul.f32 %v58_v27, %v47_v61  ;;  %v87_v10 = vmul.f32 %v58_v27, %v52_v60  ;;  %v109_v11 = vpop.permute.xlu1 %108 }
  0x8e   :  { %v104_v12 = vpop.permute.xlu0 %103  ;;  %1109 = vtanh.f32 %v115_v63  ;;  %v85_v13 = vmul.f32 %v66_v28, %v47_v61  ;;  %v89_v17 = vmul.f32 %v66_v28, %v52_v60  ;;  %v598_v18 = vadd.f32 %v582_v58, %v99_v45 }
  0x8f   :  { %1111 = vtanh.f32 %v117_v0  ;;  %v120_v19 = vadd.f32 %v104_v12, %v84_v5  ;;  %v124_v20 = vadd.f32 %v109_v11, %v88_v6  ;;  %v122_v21 = vadd.f32 %v104_v12, %v86_v7 }
  0x90   :  { %v126_v22 = vadd.f32 %v109_v11, %v90_v8  ;;  %v119_v23 = vadd.f32 %v104_v12, %v83_v9  ;;  %v123_v24 = vadd.f32 %v109_v11, %v87_v10  ;;  %v121_v31 = vadd.f32 %v104_v12, %v85_v13  ;;  %v1374_v9 = vld [vmem:[%s1587_s1 + $0x8] sm:$0xff] }
  0x91   :  { %v1098_v25 = vpop.eup %1097  ;;  %1113 = vtanh.f32 %v120_v19  ;;  %v125_v32 = vadd.f32 %v109_v11, %v89_v17  ;;  %v600_v26 = vadd.f32 %v584_v59, %v99_v45  ;;  %v597_v33 = vadd.f32 %v581_v51, %v99_v45  ;;  %v1397_v19 = vld [vmem:[%s1587_s1 + $0x10] sm:$0xff] }
  0x92   :  { %v1100_v27 = vpop.eup %1099  ;;  %1115 = vtanh.f32 %v124_v20  ;;  %v599_v34 = vadd.f32 %v583_v52, %v99_v45  ;;  %v586_v35 = vmul.f32 %v1327_v29, %v47_v61  ;;  %v590_v28 = vmul.f32 %v1327_v29, %v52_v60 }
  0x93   :  { %v1102_v36 = vpop.eup %1101  ;;  %1117 = vtanh.f32 %v122_v21  ;;  %v588_v37 = vmul.f32 %v1329_v30, %v47_v61  ;;  %v592_v38 = vmul.f32 %v1329_v30, %v52_v60  ;;  %v601_v39 = vadd.f32 %v585_v3, %v104_v12 }
  0x94   :  { %v1104_v40 = vpop.eup %1103  ;;  %1119 = vtanh.f32 %v126_v22  ;;  %v602_v41 = vadd.f32 %v586_v35, %v104_v12  ;;  %v606_v42 = vadd.f32 %v590_v28, %v109_v11  ;;  %v605_v46 = vadd.f32 %v589_v1, %v109_v11  ;;  %v1443_v28 = vpop.permute.xlu0 %145 }
  0x95   :  { %1121 = vtanh.f32 %v119_v23  ;;  %v604_v47 = vadd.f32 %v588_v37, %v104_v12  ;;  %v608_v48 = vadd.f32 %v592_v38, %v109_v11  ;;  %v603_v45 = vadd.f32 %v587_v4, %v104_v12 }
  0x96   :  { %v1106_v51 = vpop.eup %1105  ;;  %1123 = vtanh.f32 %v123_v24  ;;  %v607_v52 = vadd.f32 %v591_v2, %v109_v11 }
  0x97   :  { %v1108_v29 = vpop.eup %1107  ;;  %v1027_v53 = vpack.c.bf16 %v1106_v51, %v1098_v25  ;;  %1125 = vtanh.f32 %v121_v31  ;;  %v1420_v25 = vld [vmem:[%s1587_s1 + $0x18] sm:$0xff] }
  0x98   :  { %v1110_v54 = vpop.eup %1109  ;;  %v1035_v55 = vpack.c.bf16 %v1108_v29, %v1100_v27  ;;  %1127 = vtanh.f32 %v125_v32 }
  0x99   :  { %v1112_v30 = vpop.eup %1111  ;;  %1028 = vmatprep.subr.bf16.mxu0 %v1027_v53  ;;  %v1029_v56 = vpack.c.bf16 %v1110_v54, %v1102_v36  ;;  %1129 = vtanh.f32 %v1337_v49 }
  0x9a   :  { %1036 = vmatprep.subr.bf16.mxu1 %v1035_v55  ;;  %v1037_v57 = vpack.c.bf16 %v1112_v30, %v1104_v40  ;;  %1131 = vtanh.f32 %v598_v18  ;;  %v1454_v55 = vpop.permute.xlu0 %155 }
  0x9b   :  { %v1114_v58 = vpop.eup %1113  ;;  %1030 = vmatpush1.bf16.msra.mxu0 %v1029_v56  ;;  %1133 = vtanh.f32 %v1339_v50 }
  0x9c   :  { %v1116_v59 = vpop.eup %1115  ;;  %1038 = vmatpush1.bf16.msra.mxu1 %v1037_v57  ;;  %1135 = vtanh.f32 %v600_v26 }
  0x9d   :  { %v1118_v60 = vpop.eup %1117  ;;  %v1031_v61 = vpack.c.bf16 %v1116_v59, %v1114_v58  ;;  %1137 = vtanh.f32 %v1333_v43  ;;  %v1356_v43 = vld [vmem:[%s1587_s1] sm:$0xff] }
  0x9e   :  { %v1120_v62 = vpop.eup %1119  ;;  %1139 = vtanh.f32 %v597_v33 }
  0x9f   :  { %v1122_v63 = vpop.eup %1121  ;;  %1032 = vmatprep.subr.bf16.mxu0 %v1031_v61  ;;  %v1039_v0 = vpack.c.bf16 %v1120_v62, %v1118_v60  ;;  %1141 = vtanh.f32 %v1335_v44 }
  0xa0   :  { %v1124_v49 = vpop.eup %1123  ;;  %1143 = vtanh.f32 %v599_v34 }
  0xa1   :  { %v1126_v1 = vpop.eup %1125  ;;  %1040 = vmatprep.subr.bf16.mxu1 %v1039_v0  ;;  %v1033_v2 = vpack.c.bf16 %v1124_v49, %v1122_v63  ;;  %1145 = vtanh.f32 %v602_v41 }
  0xa2   :  { %v1128_v50 = vpop.eup %1127  ;;  %1147 = vtanh.f32 %v606_v42 }
  0xa3   :  { %v1351_v3 = vpop.eup %1129  ;;  %1034 = vmatpush1.bf16.msra.mxu0 %v1033_v2  ;;  %v1041_v4 = vpack.c.bf16 %v1128_v50, %v1126_v1  ;;  %1149 = vtanh.f32 %v604_v47 }
  0xa4   :  { %v1358_v44 = vpop.eup %1131  ;;  %1151 = vtanh.f32 %v608_v48 }
  0xa5   :  { %v1360_v5 = vpop.eup %1133  ;;  %1042 = vmatpush1.bf16.msra.mxu1 %v1041_v4  ;;  %v1059_v6 = vpack.c.bf16 %v1358_v44, %v1351_v3  ;;  %1153 = vtanh.f32 %v601_v39  ;;  %v1251_v3 = vmov 1966171168  }
  0xa6   :  { %v1364_v7 = vpop.eup %1135  ;;  %1006 = vmatmul.mubr.msk.f32.vlgmr.msra.gmra.mrb[0].mxu0 %vm163_vm0, %v1356_v43  ;;  %1155 = vtanh.f32 %v605_v46  ;;  %v1448_v46 = vpop.permute.xlu1 %150 }
  0xa7   :  { %v1368_v8 = vpop.eup %1137  ;;  %246 = vmatprep.mubr.f32.mxu0 %v1250_v14  ;;  %v1067_v10 = vpack.c.bf16 %v1364_v7, %v1360_v5  ;;  %1157 = vtanh.f32 %v603_v45  ;;  %v1526_v5 = vpop.permute.xlu0 %372 }
  0xa8   :  { %v1378_v11 = vpop.eup %1139  ;;  %1010 = vmatmul.mubr.msk.f32.vlgmr.msra.gmra.mrb[0].mxu1 %vm163_vm0, %v1356_v43  ;;  %1159 = vtanh.f32 %v607_v52 }
  0xa9   :  { %v1382_v12 = vpop.eup %1141  ;;  %335 = vmatprep.mubr.f32.mxu1 %v1250_v14  ;;  %v1061_v13 = vpack.c.bf16 %v1378_v11, %v1368_v8 }
  0xaa   :  { %v1387_v17 = vpop.eup %1143  ;;  %1007 = vmatmul.mubr.msk.f32.gmra.mrb[2].mxu0 %vm163_vm0, %v1374_v9  ;;  %v1460_v63 = vpop.permute.xlu1 %160 }
  0xab   :  { %v1391_v18 = vpop.eup %1145  ;;  %252 = vmatprep.mubr.f32.mxu0 %v1250_v14  ;;  %v1069_v20 = vpack.c.bf16 %v1387_v17, %v1382_v12 }
  0xac   :  { %v1401_v21 = vpop.eup %1147  ;;  %1011 = vmatmul.mubr.msk.f32.gmra.mrb[2].mxu1 %vm163_vm0, %v1374_v9 }
  0xad   :  { %v1405_v22 = vpop.eup %1149  ;;  %341 = vmatprep.mubr.f32.mxu1 %v1250_v14  ;;  %v1063_v23 = vpack.c.bf16 %v1401_v21, %v1391_v18 }
  0xae   :  { %v1410_v24 = vpop.eup %1151  ;;  %1008 = vmatmul.mubr.msk.f32.gmra.mrb[4].mxu0 %vm163_vm0, %v1397_v19 }
  0xaf   :  { %v1414_v31 = vpop.eup %1153  ;;  %258 = vmatprep.mubr.f32.mxu0 %v1250_v14  ;;  %v1071_v32 = vpack.c.bf16 %v1410_v24, %v1405_v22 }
  0xb0   :  { %v1424_v26 = vpop.eup %1155  ;;  %1012 = vmatmul.mubr.msk.f32.gmra.mrb[4].mxu1 %vm163_vm0, %v1397_v19 }
  0xb1   :  { %v1428_v33 = vpop.eup %1157  ;;  %347 = vmatprep.mubr.f32.mxu1 %v1250_v14  ;;  %v1065_v27 = vpack.c.bf16 %v1424_v26, %v1414_v31 }
  0xb2   :  { %v1433_v34 = vpop.eup %1159  ;;  %1009 = vmatmul.mubr.msk.f32.gmra.mrb[6].mxu0 %vm163_vm0, %v1420_v25 }
  0xb3   :  { %442 = vmatprep.mubr.f32.mxu0 %v1250_v14  ;;  %v1073_v35 = vpack.c.bf16 %v1433_v34, %v1428_v33 }
  0xb4   :  { %1013 = vmatmul.mubr.msk.f32.gmra.mrb[6].mxu1 %vm163_vm0, %v1420_v25 }
  0xb5   :  { %513 = vmatprep.mubr.f32.mxu1 %v1250_v14 }
 0x179   :  { %v242_v36 = vpop.f32.mrb[0].mxu0 }
 0x17a   :  { %v243_v37 = vadd.f32 %v242_v36, %v1443_v28  ;;  %v244_v38 = vpop.f32.mrb[1].mxu0 }
 0x17b   :  { %v331_v39 = vpop.f32.mrb[0].mxu1  ;;  %v245_v40 = vadd.f32 %v244_v38, %v1443_v28 }
 0x17c   :  { %1161 = vtanh.f32 %v243_v37  ;;  %v332_v41 = vadd.f32 %v331_v39, %v1443_v28  ;;  %v333_v42 = vpop.f32.mrb[1].mxu1 }
 0x17d   :  { %1163 = vtanh.f32 %v245_v40  ;;  %v334_v47 = vadd.f32 %v333_v42, %v1443_v28  ;;  %v248_v48 = vpop.f32.mrb[2].mxu0 }
 0x17e   :  { %1165 = vtanh.f32 %v332_v41  ;;  %v249_v45 = vadd.f32 %v248_v48, %v1448_v46  ;;  %v250_v51 = vpop.f32.mrb[3].mxu0 }
 0x17f   :  { %1167 = vtanh.f32 %v334_v47  ;;  %v337_v52 = vpop.f32.mrb[2].mxu1  ;;  %v251_v29 = vadd.f32 %v250_v51, %v1448_v46 }
 0x180   :  { %1169 = vtanh.f32 %v249_v45  ;;  %v338_v53 = vadd.f32 %v337_v52, %v1448_v46  ;;  %v339_v54 = vpop.f32.mrb[3].mxu1 }
 0x181   :  { %1171 = vtanh.f32 %v251_v29  ;;  %v340_v30 = vadd.f32 %v339_v54, %v1448_v46  ;;  %v254_v56 = vpop.f32.mrb[4].mxu0 }
 0x182   :  { %1173 = vtanh.f32 %v338_v53  ;;  %v255_v57 = vadd.f32 %v254_v56, %v1454_v55  ;;  %v256_v58 = vpop.f32.mrb[5].mxu0 }
 0x183   :  { %1175 = vtanh.f32 %v340_v30  ;;  %v343_v59 = vpop.f32.mrb[4].mxu1  ;;  %v257_v60 = vadd.f32 %v256_v58, %v1454_v55 }
 0x184   :  { %1177 = vtanh.f32 %v255_v57  ;;  %v344_v61 = vadd.f32 %v343_v59, %v1454_v55  ;;  %v345_v62 = vpop.f32.mrb[5].mxu1 }
 0x185   :  { %1179 = vtanh.f32 %v257_v60  ;;  %v346_v0 = vadd.f32 %v345_v62, %v1454_v55  ;;  %v260_v49 = vpop.f32.mrb[6].mxu0 }
 0x186   :  { %v1162_v1 = vpop.eup %1161  ;;  %1181 = vtanh.f32 %v344_v61  ;;  %v261_v2 = vadd.f32 %v260_v49, %v1460_v63  ;;  %v262_v50 = vpop.f32.mrb[7].mxu0 }
 0x187   :  { %v1164_v4 = vpop.eup %1163  ;;  %1183 = vtanh.f32 %v346_v0  ;;  %v349_v36 = vpop.f32.mrb[6].mxu1  ;;  %v263_v37 = vadd.f32 %v262_v50, %v1460_v63  ;;  %v1470_v50 = vld [vmem:[%s1587_s1 + $0x20] sm:$0x1]  ;;  %s1252_s1 = smov [#allocation2]  }
 0x188   :  { %v1166_v38 = vpop.eup %1165  ;;  %1185 = vtanh.f32 %v261_v2  ;;  %v350_v39 = vadd.f32 %v349_v36, %v1460_v63  ;;  %v351_v40 = vpop.f32.mrb[7].mxu1  ;;  %s998_s23 = sshll.u32 %s1252_s1, 4  ;;  %s999_s23 = int_to_ptr.vmem [resolvable:$true] %s998_s23 }
 0x189   :  { %v1168_v41 = vpop.eup %1167  ;;  %1187 = vtanh.f32 %v263_v37  ;;  %v352_v42 = vadd.f32 %v351_v40, %v1460_v63  ;;  %s1225_s24 = scalar_lea.vmem %s999_s23, 128  ;;  %p1230_p1 = scmp.lt.s32.totalorder %s999_s23, %s999_s23 }
 0x18a   :  { %v1170_v47 = vpop.eup %1169  ;;  %1189 = vtanh.f32 %v350_v39  ;;  %p1226_p0 = scmp.ne.s32.totalorder %s999_s23, %s1225_s24  ;;  %p1231_p2 = scmp.lt.s32.totalorder %s1225_s24, %s1225_s24 }
 0x18b   :  { %v1172_v48 = vpop.eup %1171  ;;  %1191 = vtanh.f32 %v352_v42  ;;  %v1045_v45 = vpack.c.bf16 %v1170_v47, %v1162_v1 }
 0x18c   :  { %v1174_v51 = vpop.eup %1173  ;;  %v1043_v52 = vpack.c.bf16 %v1172_v48, %v1164_v4  ;;  %p1232_p3 = por %p1231_p2, %p1230_p1 }
 0x18d   :  { %v1176_v29 = vpop.eup %1175  ;;  %v1053_v53 = vpack.c.bf16 %v1174_v51, %v1166_v38 }
 0x18e   :  { %v1178_v54 = vpop.eup %1177  ;;  %1044 = vmatprep.subr.bf16.mxu0 %v1043_v52  ;;  %v1051_v30 = vpack.c.bf16 %v1176_v29, %v1168_v41  ;;  %p1233_p4 = pnand %p1232_p3, %p1226_p0 }
 0x18f   :  { %v1180_v56 = vpop.eup %1179  ;;  %1046 = vmatpush1.bf16.msra.mxu0 %v1045_v45 }
 0x190   :  { %v1182_v57 = vpop.eup %1181  ;;  %1052 = vmatprep.subr.bf16.mxu1 %v1051_v30 }
 0x191   :  { %v1184_v58 = vpop.eup %1183  ;;  %1054 = vmatpush1.bf16.msra.mxu1 %v1053_v53 }
 0x192   :  { %v1186_v59 = vpop.eup %1185 }
 0x193   :  { %v1188_v60 = vpop.eup %1187  ;;  %v1049_v61 = vpack.c.bf16 %v1186_v59, %v1178_v54 }
 0x194   :  { %v1190_v62 = vpop.eup %1189  ;;  %v1047_v0 = vpack.c.bf16 %v1188_v60, %v1180_v56 }
 0x195   :  { %v1192_v49 = vpop.eup %1191  ;;  %v1057_v1 = vpack.c.bf16 %v1190_v62, %v1182_v57 }
 0x196   :  { %1048 = vmatprep.subr.bf16.mxu0 %v1047_v0  ;;  %v1055_v2 = vpack.c.bf16 %v1192_v49, %v1184_v58 }
 0x197   :  { %1050 = vmatpush1.bf16.msra.mxu0 %v1049_v61 }
 0x198   :  { %1056 = vmatprep.subr.bf16.mxu1 %v1055_v2  ;;  %1060 = vmatprep.subr.bf16.mxu0 %v1059_v6 }
 0x199   :  { %1058 = vmatpush1.bf16.msra.mxu1 %v1057_v1 }
 0x19a   :  { %1068 = vmatprep.subr.bf16.mxu1 %v1067_v10  ;;  %1014 = vmatmul.mubr.msk.f32.vlgmr.msra.gmra.mrb[8].mxu0 %vm163_vm0, %v1470_v50 }
 0x19b   :  { %1062 = vmatpush1.bf16.msra.mxu0 %v1061_v13  ;;  %689 = vmatprep.mubr.f32.mxu0 %v1250_v14 }
 0x19c   :  { %1015 = vmatmul.mubr.msk.f32.vlgmr.msra.gmra.mrb[8].mxu1 %vm163_vm0, %v1470_v50  ;;  %1064 = vmatprep.subr.bf16.mxu0 %v1063_v23 }
 0x19d   :  { %1070 = vmatpush1.bf16.msra.mxu1 %v1069_v20  ;;  %778 = vmatprep.mubr.f32.mxu1 %v1250_v14 }
 0x19e   :  { %1072 = vmatprep.subr.bf16.mxu1 %v1071_v32 }
 0x19f   :  { %1066 = vmatpush1.bf16.msra.mxu0 %v1065_v27 }
 0x1a1   :  { %1074 = vmatpush1.bf16.msra.mxu1 %v1073_v35 }
 0x1a2   :  { %1017 = vmatmul.mubr.msk.f32.vlgmr.msra.gmra.mrb[10].mxu0 %vm163_vm0, %v1356_v43 }
 0x1a3   :  { %695 = vmatprep.mubr.f32.mxu0 %v1250_v14 }
 0x1a4   :  { %1021 = vmatmul.mubr.msk.f32.vlgmr.msra.gmra.mrb[10].mxu1 %vm163_vm0, %v1356_v43  ;;  %v527_v43 = vunpack.c.l.s4 %v1251_v3 }
 0x1a5   :  { %784 = vmatprep.mubr.f32.mxu1 %v1250_v14 }
 0x1a6   :  { %1018 = vmatmul.mubr.msk.f32.gmra.mrb[12].mxu0 %vm163_vm0, %v1374_v9  ;;  %v528_v44 = vunpack.c.0.s8 %v527_v43 }
 0x1a7   :  { %701 = vmatprep.mubr.f32.mxu0 %v1250_v14 }
 0x1a8   :  { %1022 = vmatmul.mubr.msk.f32.gmra.mrb[12].mxu1 %vm163_vm0, %v1374_v9  ;;  %v1531_v11 = vsub.s32 %v528_v44, %v1315_v16 }
 0x1a9   :  { %790 = vmatprep.mubr.f32.mxu1 %v1250_v14 }
 0x1aa   :  { %1019 = vmatmul.mubr.msk.f32.gmra.mrb[14].mxu0 %vm163_vm0, %v1397_v19 }
 0x1ab   :  { %707 = vmatprep.mubr.f32.mxu0 %v1250_v14 }
 0x1ac   :  { %1023 = vmatmul.mubr.msk.f32.gmra.mrb[14].mxu1 %vm163_vm0, %v1397_v19 }
 0x1ad   :  { %796 = vmatprep.mubr.f32.mxu1 %v1250_v14 }
 0x1ae   :  { %1020 = vmatmul.mubr.msk.f32.gmra.mrb[16].mxu0 %vm163_vm0, %v1420_v25 }
 0x1af   :  { %883 = vmatprep.mubr.f32.mxu0 %v1250_v14 }
 0x1b0   :  { %1024 = vmatmul.mubr.msk.f32.gmra.mrb[16].mxu1 %vm163_vm0, %v1420_v25 }
 0x1b1   :  { %954 = vmatprep.mubr.f32.mxu1 %v1250_v14 }
 0x26d   :  { %v444_v6 = vpop.f32.mrb[8].mxu0 }
 0x26e   :  { %v445_v7 = vadd.f32 %v444_v6, %v1526_v5  ;;  %v446_v8 = vpop.f32.mrb[9].mxu0 }
 0x26f   :  { %v515_v9 = vpop.f32.mrb[8].mxu1  ;;  %v447_v10 = vadd.f32 %v446_v8, %v1526_v5 }
 0x270   :  { %v516_v12 = vadd.f32 %v515_v9, %v1526_v5  ;;  %v517_v13 = vpop.f32.mrb[9].mxu1 }
 0x271   :  { %v524_v17 = vcombine.low %v445_v7, %v447_v10  ;;  %v518_v14 = vadd.f32 %v517_v13, %v1526_v5 }
 0x273   :  { %v532_v18 = vrot.slane %v524_v17, %v1531_v11  ;;  %v525_v19 = vcombine.low %v516_v12, %v518_v14 }
 0x275   :  { %v539_v20 = vrot.slane %v525_v19, %v1531_v11  ;;  %v691_v21 = vpop.f32.mrb[10].mxu0 }
 0x276   :  { %v692_v22 = vadd.f32 %v691_v21, %v1443_v28  ;;  %v693_v23 = vpop.f32.mrb[11].mxu0 }
 0x277   :  { %v540_v24 = vcombine.low %v532_v18, %v539_v20  ;;  %v780_v31 = vpop.f32.mrb[10].mxu1  ;;  %v694_v16 = vadd.f32 %v693_v23, %v1443_v28 }
 0x278   :  { %1193 = vtanh.f32 %v692_v22  ;;  %v781_v25 = vadd.f32 %v780_v31, %v1443_v28  ;;  %v782_v32 = vpop.f32.mrb[11].mxu1 }
 0x279   :  { %1195 = vtanh.f32 %v694_v16  ;;  %v783_v33 = vadd.f32 %v782_v32, %v1443_v28  ;;  %v697_v27 = vpop.f32.mrb[12].mxu0  ;;  %v547_v34 = vrot.slane %v540_v24, %v1531_v11 }
 0x27a   :  { %1197 = vtanh.f32 %v781_v25  ;;  %v698_v35 = vadd.f32 %v697_v27, %v1448_v46  ;;  %v699_v4 = vpop.f32.mrb[13].mxu0 }
 0x27b   :  { %1199 = vtanh.f32 %v783_v33  ;;  %v786_v36 = vpop.f32.mrb[12].mxu1  ;;  %v700_v37 = vadd.f32 %v699_v4, %v1448_v46  ;;  %553 = vst.msk [vmem:[#allocation2] sm:$0xf] %vm1541_vm1, %v547_v34 }
 0x27c   :  { %1201 = vtanh.f32 %v698_v35  ;;  %v787_v15 = vadd.f32 %v786_v36, %v1448_v46  ;;  %v788_v38 = vpop.f32.mrb[13].mxu1 }
 0x27d   :  { %1203 = vtanh.f32 %v700_v37  ;;  %v789_v28 = vadd.f32 %v788_v38, %v1448_v46  ;;  %v703_v39 = vpop.f32.mrb[14].mxu0 }
 0x27e   :  { %1205 = vtanh.f32 %v787_v15  ;;  %v704_v40 = vadd.f32 %v703_v39, %v1454_v55  ;;  %v705_v41 = vpop.f32.mrb[15].mxu0 }
 0x27f   :  { %1207 = vtanh.f32 %v789_v28  ;;  %v792_v42 = vpop.f32.mrb[14].mxu1  ;;  %v706_v47 = vadd.f32 %v705_v41, %v1454_v55 }
 0x280   :  { %1209 = vtanh.f32 %v704_v40  ;;  %v793_v48 = vadd.f32 %v792_v42, %v1454_v55  ;;  %v794_v45 = vpop.f32.mrb[15].mxu1 }
 0x281   :  { %1211 = vtanh.f32 %v706_v47  ;;  %v795_v51 = vadd.f32 %v794_v45, %v1454_v55  ;;  %v709_v52 = vpop.f32.mrb[16].mxu0 }
 0x282   :  { %v1194_v29 = vpop.eup %1193  ;;  %1213 = vtanh.f32 %v793_v48  ;;  %v710_v46 = vadd.f32 %v709_v52, %v1460_v63  ;;  %v711_v53 = vpop.f32.mrb[17].mxu0 }
 0x283   :  { %v1196_v54 = vpop.eup %1195  ;;  %1215 = vtanh.f32 %v795_v51  ;;  %v798_v30 = vpop.f32.mrb[16].mxu1  ;;  %v712_v56 = vadd.f32 %v711_v53, %v1460_v63 }
 0x284   :  { %v1198_v57 = vpop.eup %1197  ;;  %1217 = vtanh.f32 %v710_v46  ;;  %v799_v58 = vadd.f32 %v798_v30, %v1460_v63  ;;  %v800_v59 = vpop.f32.mrb[17].mxu1 }
 0x285   :  { %v1200_v60 = vpop.eup %1199  ;;  %1219 = vtanh.f32 %v712_v56  ;;  %v801_v55 = vadd.f32 %v800_v59, %v1460_v63 }
 0x286   :  { %v1202_v61 = vpop.eup %1201  ;;  %1221 = vtanh.f32 %v799_v58 }
 0x287   :  { %v1204_v62 = vpop.eup %1203  ;;  %1223 = vtanh.f32 %v801_v55  ;;  %v1077_v0 = vpack.c.bf16 %v1202_v61, %v1194_v29 }
 0x288   :  { %v1206_v49 = vpop.eup %1205  ;;  %v1075_v1 = vpack.c.bf16 %v1204_v62, %v1196_v54 }
 0x289   :  { %v1208_v2 = vpop.eup %1207  ;;  %v1085_v3 = vpack.c.bf16 %v1206_v49, %v1198_v57 }
 0x28a   :  { %v1210_v43 = vpop.eup %1209  ;;  %1076 = vmatprep.subr.bf16.mxu0 %v1075_v1  ;;  %v1083_v44 = vpack.c.bf16 %v1208_v2, %v1200_v60 }
 0x28b   :  { %v1212_v6 = vpop.eup %1211  ;;  %1078 = vmatpush1.bf16.msra.mxu0 %v1077_v0 }
 0x28c   :  { %v1214_v7 = vpop.eup %1213  ;;  %1084 = vmatprep.subr.bf16.mxu1 %v1083_v44 }
 0x28d   :  { %v1216_v8 = vpop.eup %1215  ;;  %1086 = vmatpush1.bf16.msra.mxu1 %v1085_v3 }
 0x28e   :  { %v1218_v9 = vpop.eup %1217 }
 0x28f   :  { %v1220_v63 = vpop.eup %1219  ;;  %v1081_v10 = vpack.c.bf16 %v1218_v9, %v1210_v43 }
 0x290   :  { %v1222_v12 = vpop.eup %1221  ;;  %v1079_v13 = vpack.c.bf16 %v1220_v63, %v1212_v6 }
 0x291   :  { %v1224_v17 = vpop.eup %1223  ;;  %v1089_v14 = vpack.c.bf16 %v1222_v12, %v1214_v7 }
 0x292   :  { %1080 = vmatprep.subr.bf16.mxu0 %v1079_v13  ;;  %v1087_v18 = vpack.c.bf16 %v1224_v17, %v1216_v8 }
 0x293   :  { %1082 = vmatpush1.bf16.msra.mxu0 %v1081_v10 }
 0x294   :  { %1088 = vmatprep.subr.bf16.mxu1 %v1087_v18 }
 0x295   :  { %1090 = vmatpush1.bf16.msra.mxu1 %v1089_v14 }
 0x296   :  { %1025 = vmatmul.mubr.msk.f32.vlgmr.msra.gmra.mrb[18].mxu0 %vm163_vm0, %v1470_v50 }
 0x298   :  { %1026 = vmatmul.mubr.msk.f32.vlgmr.msra.gmra.mrb[18].mxu1 %vm163_vm0, %v1470_v50 }
 0x369   :  { %v885_v19 = vpop.f32.mrb[18].mxu0 }
 0x36a   :  { %v886_v20 = vadd.f32 %v885_v19, %v1526_v5  ;;  %v887_v21 = vpop.f32.mrb[19].mxu0 }
 0x36b   :  { %v956_v22 = vpop.f32.mrb[18].mxu1  ;;  %v888_v23 = vadd.f32 %v887_v21, %v1526_v5 }
 0x36c   :  { %v957_v24 = vadd.f32 %v956_v22, %v1526_v5  ;;  %v958_v31 = vpop.f32.mrb[19].mxu1 }
 0x36d   :  { %v965_v16 = vcombine.low %v886_v20, %v888_v23  ;;  %v959_v25 = vadd.f32 %v958_v31, %v1526_v5 }
 0x36f   :  { %v973_v32 = vrot.slane %v965_v16, %v1531_v11  ;;  %v966_v33 = vcombine.low %v957_v24, %v959_v25 }
 0x371   :  { %v980_v27 = vrot.slane %v966_v33, %v1531_v11 }
 0x373   :  { %v981_v50 = vcombine.low %v973_v32, %v980_v27 }
 0x375   :  { %v988_v34 = vrot.slane %v981_v50, %v1531_v11 }
 0x377   :  { %991 = vst.msk [vmem:[#allocation2 + $0x4] sm:$0xf] %vm1541_vm1, %v988_v34 }
 0x378   :  { %1236 = shalt.err (!%p1233_p4)
}
 0x379   :  { %s1237_s27 = scalar_lea.hbm %s1589_s3, 128 }
 0x37a   :  { %p1238_p5 = scmp.ne.s32.totalorder %s1589_s3, %s1237_s27  ;;  %p1241_p6 = scmp.lt.u32.totalorder %s1237_s27, %s1589_s3 }
 0x37c   :  { %p1243_p7 = pnand %p1241_p6, %p1238_p5 }
 0x37e   :  { %1246 = shalt.err (!%p1243_p7)
}
 0x37f   :  { %1001 = dma.vmem_to_hbm [thread:$0]  %s999_s23, 128, %s1589_s3, [#allocation3]  }
 0x380   :  { %1247 = dma.done.wait [#allocation3], 128  }
 0x381   :  { %1248 = vsyncadd [#allocation3], 4294967168 }
 0x382   :  { %1005 = vsyncpa [#allocation3], 1 }

</bundles_post_ra>
